<compile_context>
chip_gen: v7x
topology: tpu7x:2x2x1
jax: 0.10.0
libtpu: 0.0.40
codegen_flags: <defaults>
</compile_context>

<pallas_src>
import functools

import jax
import jax.numpy as jnp
from jax.experimental import pallas as pl
from jax.experimental.pallas import tpu as pltpu


def _round_up(x, m):
    return ((x + m - 1) // m) * m


def _proxy_proto_kernel(x_ref, pt_ref, t_ref, out_ref, m_ref, l_ref, w_ref, *,
                        smoothing, n_total, c_total, block_n, block_c):
    """One (batch tile, class tile) grid step.

    x_ref:   (TN, E)  raw embeddings tile (any float dtype)
    pt_ref:  (E, TC)  bf16 unit proxies, pre-scaled by 2*scaling_p/temperature, transposed
    t_ref:   (TN, 1)  int32 labels tile
    out_ref: (8, 128) f32 per-batch-tile partial-sum block (written at last class step)
    m_ref/l_ref/w_ref: (TN,1) f32 online-softmax max / exp-sum / weighted-logit-sum
    """
    i = pl.program_id(0)          # batch tile
    j = pl.program_id(1)          # class tile
    nc = pl.num_programs(1)

    @pl.when(j == 0)
    def _init():
        m_ref[...] = jnp.full(m_ref.shape, -jnp.inf, jnp.float32)
        l_ref[...] = jnp.zeros(l_ref.shape, jnp.float32)
        w_ref[...] = jnp.zeros(w_ref.shape, jnp.float32)

    # F.normalize(X, dim=-1): x * rsqrt(max(|x|^2, eps^2)), f32 math, bf16 MXU operand.
    X = x_ref[...].astype(jnp.float32)                                   # (TN, E)
    inv_nrm = jax.lax.rsqrt(
        jnp.maximum(jnp.sum(X * X, axis=-1, keepdims=True), 1e-24))
    Xn = (X * inv_nrm).astype(jnp.bfloat16)

    # Shift-equivalent logits block (scale folded into pt_ref), f32 accumulation.
    S = jnp.dot(Xn, pt_ref[...], preferred_element_type=jnp.float32)     # (TN, TC)

    T = t_ref[...]                                                       # (TN, 1)
    col = j * block_c + jax.lax.broadcasted_iota(jnp.int32, S.shape, 1)  # (TN, TC)
    valid = col < c_total                                                # mask padded classes

    # Fused weighted-logit sum: sum_c (off_w + tgt_w*[c==T]) * S_ic
    off_w = smoothing / (c_total - 1)
    tgt_w = 1.0 - smoothing - off_w
    wgt = off_w + tgt_w * (col == T).astype(jnp.float32)
    w_ref[...] += jnp.sum(jnp.where(valid, wgt * S, 0.0),
                          axis=-1, keepdims=True)

    # Online log-sum-exp over class tiles.
    Sm = jnp.where(valid, S, -jnp.inf)
    m_old = m_ref[...]
    m_new = jnp.maximum(m_old, jnp.max(Sm, axis=-1, keepdims=True))
    alpha = jnp.exp(m_old - m_new)
    p = jnp.exp(Sm - m_new)
    l_ref[...] = alpha * l_ref[...] + jnp.sum(p, axis=-1, keepdims=True)
    m_ref[...] = m_new

    @pl.when(j == nc - 1)
    def _finalize():
        lse = m_ref[...] + jnp.log(l_ref[...])                 # (TN, 1)
        per_sample = lse - w_ref[...]                          # (TN, 1)
        # Mask padded batch rows BEFORE reducing (garbage/NaN rows -> 0).
        row = i * block_n + jax.lax.broadcasted_iota(jnp.int32, per_sample.shape, 0)
        masked = jnp.where(row < n_total, per_sample, 0.0)
        ps = jnp.sum(masked, axis=0, keepdims=True)            # (1, 1) tile partial sum
        r = jax.lax.broadcasted_iota(jnp.int32, (8, 128), 0)
        c = jax.lax.broadcasted_iota(jnp.int32, (8, 128), 1)
        out_ref[...] = jnp.where((r == 0) & (c == 0),
                                 jnp.broadcast_to(ps, (8, 128)), 0.0)


def proxy_proto_loss(X, T, proxies, old_proxies,
                     smoothing=0.1, temperature=1.0, scaling_p=3.0,
                     block_n=512, block_c=2048):
    """JAX wrapper reproducing ProxyProto.forward(X, T, old_proxies)."""
    if old_proxies is not None:
        P_all = jnp.concatenate([old_proxies, proxies], axis=0)  # torch.cat((O, P), 0)
    else:
        P_all = proxies

    N, E = X.shape
    C = P_all.shape[0]

    # Normalize + fold 2*scaling_p/temperature + transpose + bf16-cast ONCE
    # (shared by every batch tile; lane-dense (E, C) MXU operand).
    Pf = P_all.astype(jnp.float32)
    p_inv = jax.lax.rsqrt(
        jnp.maximum(jnp.sum(Pf * Pf, axis=-1, keepdims=True), 1e-24))
    scale = 2.0 * float(scaling_p) / float(temperature)
    Pt = jnp.transpose(Pf * p_inv * scale).astype(jnp.bfloat16)          # (E, C) bf16

    T2 = T.reshape(N, 1).astype(jnp.int32)

    TN = min(int(block_n), _round_up(N, 8))      # batch tile (multiple of 8 sublanes)
    TC = C if C <= int(block_c) else int(block_c)  # class tile (= C or mult. of 128)
    Gn = pl.cdiv(N, TN)
    Gc = pl.cdiv(C, TC)

    kernel = functools.partial(
        _proxy_proto_kernel,
        smoothing=float(smoothing),
        n_total=N,
        c_total=C,
        block_n=TN,
        block_c=TC,
    )

    partial = pl.pallas_call(
        kernel,
        out_shape=jax.ShapeDtypeStruct((Gn * 8, 128), jnp.float32),
        grid=(Gn, Gc),
        in_specs=[
            pl.BlockSpec((TN, E), lambda i, j: (i, 0)),   # X batch tile
            pl.BlockSpec((E, TC), lambda i, j: (0, j)),   # proxies class tile (bf16)
            pl.BlockSpec((TN, 1), lambda i, j: (i, 0)),   # labels tile
        ],
        out_specs=pl.BlockSpec((8, 128), lambda i, j: (i, 0)),  # per-tile partial sum block
        scratch_shapes=[pltpu.VMEM((TN, 1), jnp.float32)] * 3,  # m, l, weighted-sum
        compiler_params=pltpu.CompilerParams(
            dimension_semantics=("parallel", "arbitrary"),
            vmem_limit_bytes=64 * 1024 * 1024,
        ),
        cost_estimate=pl.CostEstimate(
            flops=2 * N * C * E,
            transcendentals=N * C,
            bytes_accessed=4 * N * E + 2 * E * C + 4 * N + 4 * Gn * 1024,
        ),
    )(X, Pt, T2)

    # Only element (0, 0) of each (8, 128) tile block is non-zero (the tile sum).
    loss = jnp.sum(partial) / N
    return loss, None


def _reference_loss(X, T, proxies, old_proxies,
                    smoothing=0.1, temperature=1.0, scaling_p=3.0):
    """Pure-JAX f32 reference of the PyTorch forward for correctness checking."""
    def l2n(a):
        return a / jnp.maximum(jnp.linalg.norm(a, axis=-1, keepdims=True), 1e-12)

    P = l2n(proxies) * scaling_p
    if old_proxies is not None:
        O = l2n(old_proxies) * scaling_p
        P = jnp.concatenate([O, P], axis=0)
    Xn = l2n(X)
    diff = Xn[:, None, :] - P[None, :, :]
    D = jnp.sum(diff * diff, axis=-1)                 # cdist ** 2
    C = P.shape[0]
    Tsm = jax.nn.one_hot(T, C) * (1.0 - smoothing)
    Tsm = jnp.where(Tsm == 0, smoothing / (C - 1), Tsm)
    logp = jax.nn.log_softmax(-D / temperature, axis=-1)
    return jnp.mean(jnp.sum(-Tsm * logp, axis=-1))


if __name__ == "__main__":
    key = jax.random.PRNGKey(0)
    k1, k2, k3, k4 = jax.random.split(key, 4)

    nb_classes, old_classes, sz_embedding, batch = 4, 4, 32, 8

    # Deterministic "parameter" init matching torch.randn(nb_classes, sz_embedding) / 8
    proxies = jax.random.normal(k1, (nb_classes, sz_embedding), jnp.float32) / 8.0
    old_proxies = jax.random.normal(k2, (old_classes, sz_embedding), jnp.float32) / 8.0

    X = jax.random.normal(k3, (batch, sz_embedding), jnp.float32)
    T = jax.random.randint(k4, (batch,), 0, nb_classes + old_classes, dtype=jnp.int32)

    loss, aux = proxy_proto_loss(X, T, proxies, old_proxies,
                                 smoothing=0.1, temperature=1.0, scaling_p=3.0)
    loss = jax.block_until_ready(loss)

    ref = _reference_loss(X, T, proxies, old_proxies,
                          smoothing=0.1, temperature=1.0, scaling_p=3.0)
    assert aux is None
    # bf16 MXU operands (f32 accumulation) -> loosen tolerance vs the f32 reference.
    assert jnp.allclose(loss, ref, atol=3e-2, rtol=1e-3), (loss, ref)
    print("KERNEL_OK")
</pallas_src>

<mosaic_0001>
module attributes {stable_mosaic.version = 11 : i64} {
  func.func @_proxy_proto_kernel(%arg0: i32, %arg1: i32, %arg2: memref<8x32xf32, #tpu.memory_space<vmem>>, %arg3: memref<32x8xbf16, #tpu.memory_space<vmem>>, %arg4: memref<8x1xi32, #tpu.memory_space<vmem>>, %arg5: memref<8x128xf32, #tpu.memory_space<vmem>>, %arg6: memref<8x1xf32, #tpu.memory_space<vmem>>, %arg7: memref<8x1xf32, #tpu.memory_space<vmem>>, %arg8: memref<8x1xf32, #tpu.memory_space<vmem>>) attributes {dimension_semantics = [#tpu.dimension_semantics<parallel>, #tpu.dimension_semantics<arbitrary>], iteration_bounds = array<i64: 1, 1>, scalar_prefetch = 0 : i64, scratch_operands = 3 : i64, tpu.core_type = #tpu.core_type<tc>, window_params = [{transform_indices = @transform_0, window_bounds = array<i64: 8, 32>}, {transform_indices = @transform_1, window_bounds = array<i64: 32, 8>}, {transform_indices = @transform_2, window_bounds = array<i64: 8, 1>}, {transform_indices = @transform_3, window_bounds = array<i64: 8, 128>}]} {
    %c0_i32 = arith.constant 0 : i32
    %0 = arith.cmpi eq, %arg1, %c0_i32 : i32
    %1 = arith.extui %0 : i1 to i32
    %c0_i32_0 = arith.constant 0 : i32
    %2 = arith.cmpi ne, %1, %c0_i32_0 : i32
    scf.if %2 {
      %cst_30 = arith.constant 0xFF800000 : f32
      %59 = vector.broadcast %cst_30 : f32 to vector<8x1xf32>
      %c0_31 = arith.constant 0 : index
      %c0_32 = arith.constant 0 : index
      %60 = vector.load %arg6[%c0_31, %c0_32] : memref<8x1xf32, #tpu.memory_space<vmem>>, vector<8x1xf32>
      tpu.vector_store %arg6[%c0_31, %c0_32], %59 {strides = array<i32>} : memref<8x1xf32, #tpu.memory_space<vmem>>, vector<8x1xf32>,
      %cst_33 = arith.constant 0.000000e+00 : f32
      %61 = vector.broadcast %cst_33 : f32 to vector<8x1xf32>
      %c0_34 = arith.constant 0 : index
      %c0_35 = arith.constant 0 : index
      %62 = vector.load %arg7[%c0_34, %c0_35] : memref<8x1xf32, #tpu.memory_space<vmem>>, vector<8x1xf32>
      tpu.vector_store %arg7[%c0_34, %c0_35], %61 {strides = array<i32>} : memref<8x1xf32, #tpu.memory_space<vmem>>, vector<8x1xf32>,
      %cst_36 = arith.constant 0.000000e+00 : f32
      %63 = vector.broadcast %cst_36 : f32 to vector<8x1xf32>
      %c0_37 = arith.constant 0 : index
      %c0_38 = arith.constant 0 : index
      %64 = vector.load %arg8[%c0_37, %c0_38] : memref<8x1xf32, #tpu.memory_space<vmem>>, vector<8x1xf32>
      tpu.vector_store %arg8[%c0_37, %c0_38], %63 {strides = array<i32>} : memref<8x1xf32, #tpu.memory_space<vmem>>, vector<8x1xf32>,
    } else {
    }
    %c0 = arith.constant 0 : index
    %c0_1 = arith.constant 0 : index
    %3 = vector.load %arg2[%c0, %c0_1] : memref<8x32xf32, #tpu.memory_space<vmem>>, vector<8x32xf32>
    %4 = arith.mulf %3, %3 : vector<8x32xf32>
    %cst = arith.constant dense<0.000000e+00> : vector<8xf32>
    %5 = vector.multi_reduction <add>, %4, %cst [1] : vector<8x32xf32> to vector<8xf32>
    %6 = vector.shape_cast %5 : vector<8xf32> to vector<8x1xf32>
    %cst_2 = arith.constant 1.000000e-24 : f32
    %7 = vector.broadcast %cst_2 : f32 to vector<8x1xf32>
    %8 = arith.maximumf %6, %7 : vector<8x1xf32>
    %9 = math.rsqrt %8 : vector<8x1xf32>
    %10 = vector.broadcast %9 : vector<8x1xf32> to vector<8x32xf32>
    %11 = arith.mulf %3, %10 : vector<8x32xf32>
    %12 = arith.truncf %11 : vector<8x32xf32> to vector<8x32xbf16>
    %c0_3 = arith.constant 0 : index
    %c0_4 = arith.constant 0 : index
    %13 = vector.load %arg3[%c0_3, %c0_4] : memref<32x8xbf16, #tpu.memory_space<vmem>>, vector<32x8xbf16>
    %cst_5 = arith.constant dense<0.000000e+00> : vector<8x8xf32>
    %14 = tpu.matmul %12, %13, %cst_5 {dimension_numbers = #tpu.dot_dimension_numbers<[1], [0], [0], [1], [0, 0, 1, 1], [], []>} : vector<8x32xbf16>, vector<32x8xbf16>, vector<8x8xf32> -> vector<8x8xf32>
    %c0_6 = arith.constant 0 : index
    %c0_7 = arith.constant 0 : index
    %15 = vector.load %arg4[%c0_6, %c0_7] : memref<8x1xi32, #tpu.memory_space<vmem>>, vector<8x1xi32>
    %c8_i32 = arith.constant 8 : i32
    %16 = arith.muli %arg1, %c8_i32 : i32
    %17 = tpu.iota {dimensions = array<i32: 1>} : vector<8x8xi32>
    %18 = vector.broadcast %16 : i32 to vector<8x8xi32>
    %19 = arith.addi %18, %17 : vector<8x8xi32>
    %c8_i32_8 = arith.constant 8 : i32
    %20 = vector.broadcast %c8_i32_8 : i32 to vector<8x8xi32>
    %21 = arith.cmpi slt, %19, %20 : vector<8x8xi32>
    %22 = vector.broadcast %15 : vector<8x1xi32> to vector<8x8xi32>
    %23 = arith.cmpi eq, %19, %22 : vector<8x8xi32>
    %24 = arith.extui %23 : vector<8x8xi1> to vector<8x8xi32>
    %25 = arith.sitofp %24 : vector<8x8xi32> to vector<8x8xf32>
    %cst_9 = arith.constant 0.885714293 : f32
    %26 = vector.broadcast %cst_9 : f32 to vector<8x8xf32>
    %27 = arith.mulf %26, %25 : vector<8x8xf32>
    %cst_10 = arith.constant 0.0142857144 : f32
    %28 = vector.broadcast %cst_10 : f32 to vector<8x8xf32>
    %29 = arith.addf %28, %27 : vector<8x8xf32>
    %c0_11 = arith.constant 0 : index
    %c0_12 = arith.constant 0 : index
    %30 = vector.load %arg8[%c0_11, %c0_12] : memref<8x1xf32, #tpu.memory_space<vmem>>, vector<8x1xf32>
    %31 = arith.mulf %29, %14 : vector<8x8xf32>
    %cst_13 = arith.constant 0.000000e+00 : f32
    %32 = vector.broadcast %cst_13 : f32 to vector<8x8xf32>
    %33 = arith.select %21, %31, %32 : vector<8x8xi1>, vector<8x8xf32>
    %cst_14 = arith.constant dense<0.000000e+00> : vector<8xf32>
    %34 = vector.multi_reduction <add>, %33, %cst_14 [1] : vector<8x8xf32> to vector<8xf32>
    %35 = vector.shape_cast %34 : vector<8xf32> to vector<8x1xf32>
    %36 = arith.addf %30, %35 : vector<8x1xf32>
    %c0_15 = arith.constant 0 : index
    %c0_16 = arith.constant 0 : index
    %37 = vector.load %arg8[%c0_15, %c0_16] : memref<8x1xf32, #tpu.memory_space<vmem>>, vector<8x1xf32>
    tpu.vector_store %arg8[%c0_15, %c0_16], %36 {strides = array<i32>} : memref<8x1xf32, #tpu.memory_space<vmem>>, vector<8x1xf32>,
    %cst_17 = arith.constant 0xFF800000 : f32
    %38 = vector.broadcast %cst_17 : f32 to vector<8x8xf32>
    %39 = arith.select %21, %14, %38 : vector<8x8xi1>, vector<8x8xf32>
    %c0_18 = arith.constant 0 : index
    %c0_19 = arith.constant 0 : index
    %40 = vector.load %arg6[%c0_18, %c0_19] : memref<8x1xf32, #tpu.memory_space<vmem>>, vector<8x1xf32>
    %cst_20 = arith.constant dense<0xFF800000> : vector<8xf32>
    %41 = vector.multi_reduction <maximumf>, %39, %cst_20 [1] : vector<8x8xf32> to vector<8xf32>
    %42 = vector.shape_cast %41 : vector<8xf32> to vector<8x1xf32>
    %43 = arith.maximumf %40, %42 : vector<8x1xf32>
    %44 = arith.subf %40, %43 : vector<8x1xf32>
    %45 = math.exp %44 : vector<8x1xf32>
    %46 = vector.broadcast %43 : vector<8x1xf32> to vector<8x8xf32>
    %47 = arith.subf %39, %46 : vector<8x8xf32>
    %48 = math.exp %47 : vector<8x8xf32>
    %c0_21 = arith.constant 0 : index
    %c0_22 = arith.constant 0 : index
    %49 = vector.load %arg7[%c0_21, %c0_22] : memref<8x1xf32, #tpu.memory_space<vmem>>, vector<8x1xf32>
    %50 = arith.mulf %45, %49 : vector<8x1xf32>
    %cst_23 = arith.constant dense<0.000000e+00> : vector<8xf32>
    %51 = vector.multi_reduction <add>, %48, %cst_23 [1] : vector<8x8xf32> to vector<8xf32>
    %52 = vector.shape_cast %51 : vector<8xf32> to vector<8x1xf32>
    %53 = arith.addf %50, %52 : vector<8x1xf32>
    %c0_24 = arith.constant 0 : index
    %c0_25 = arith.constant 0 : index
    %54 = vector.load %arg7[%c0_24, %c0_25] : memref<8x1xf32, #tpu.memory_space<vmem>>, vector<8x1xf32>
    tpu.vector_store %arg7[%c0_24, %c0_25], %53 {strides = array<i32>} : memref<8x1xf32, #tpu.memory_space<vmem>>, vector<8x1xf32>,
    %c0_26 = arith.constant 0 : index
    %c0_27 = arith.constant 0 : index
    %55 = vector.load %arg6[%c0_26, %c0_27] : memref<8x1xf32, #tpu.memory_space<vmem>>, vector<8x1xf32>
    tpu.vector_store %arg6[%c0_26, %c0_27], %43 {strides = array<i32>} : memref<8x1xf32, #tpu.memory_space<vmem>>, vector<8x1xf32>,
    %c0_i32_28 = arith.constant 0 : i32
    %56 = arith.cmpi eq, %arg1, %c0_i32_28 : i32
    %57 = arith.extui %56 : i1 to i32
    %c0_i32_29 = arith.constant 0 : i32
    %58 = arith.cmpi ne, %57, %c0_i32_29 : i32
    scf.if %58 {
      %c0_30 = arith.constant 0 : index
      %c0_31 = arith.constant 0 : index
      %59 = vector.load %arg6[%c0_30, %c0_31] : memref<8x1xf32, #tpu.memory_space<vmem>>, vector<8x1xf32>
      %c0_32 = arith.constant 0 : index
      %c0_33 = arith.constant 0 : index
      %60 = vector.load %arg7[%c0_32, %c0_33] : memref<8x1xf32, #tpu.memory_space<vmem>>, vector<8x1xf32>
      %61 = math.log %60 : vector<8x1xf32>
      %62 = arith.addf %59, %61 : vector<8x1xf32>
      %c0_34 = arith.constant 0 : index
      %c0_35 = arith.constant 0 : index
      %63 = vector.load %arg8[%c0_34, %c0_35] : memref<8x1xf32, #tpu.memory_space<vmem>>, vector<8x1xf32>
      %64 = arith.subf %62, %63 : vector<8x1xf32>
      %c8_i32_36 = arith.constant 8 : i32
      %65 = arith.muli %arg0, %c8_i32_36 : i32
      %66 = tpu.iota {dimensions = array<i32: 0>} : vector<8x1xi32>
      %67 = vector.broadcast %65 : i32 to vector<8x1xi32>
      %68 = arith.addi %67, %66 : vector<8x1xi32>
      %c8_i32_37 = arith.constant 8 : i32
      %69 = vector.broadcast %c8_i32_37 : i32 to vector<8x1xi32>
      %70 = arith.cmpi slt, %68, %69 : vector<8x1xi32>
      %cst_38 = arith.constant 0.000000e+00 : f32
      %71 = vector.broadcast %cst_38 : f32 to vector<8x1xf32>
      %72 = arith.select %70, %64, %71 : vector<8x1xi1>, vector<8x1xf32>
      %cst_39 = arith.constant dense<0.000000e+00> : vector<1xf32>
      %73 = vector.multi_reduction <add>, %72, %cst_39 [0] : vector<8x1xf32> to vector<1xf32>
      %74 = vector.shape_cast %73 : vector<1xf32> to vector<1x1xf32>
      %75 = tpu.iota {dimensions = array<i32: 0>} : vector<8x128xi32>
      %76 = tpu.iota {dimensions = array<i32: 1>} : vector<8x128xi32>
      %c0_i32_40 = arith.constant 0 : i32
      %77 = vector.broadcast %c0_i32_40 : i32 to vector<8x128xi32>
      %78 = arith.cmpi eq, %75, %77 : vector<8x128xi32>
      %c0_i32_41 = arith.constant 0 : i32
      %79 = vector.broadcast %c0_i32_41 : i32 to vector<8x128xi32>
      %80 = arith.cmpi eq, %76, %79 : vector<8x128xi32>
      %81 = arith.andi %78, %80 : vector<8x128xi1>
      %82 = vector.shape_cast %74 : vector<1x1xf32> to vector<1x1xf32>
      %83 = vector.broadcast %82 : vector<1x1xf32> to vector<8x128xf32>
      %cst_42 = arith.constant 0.000000e+00 : f32
      %84 = vector.broadcast %cst_42 : f32 to vector<8x128xf32>
      %85 = arith.select %81, %83, %84 : vector<8x128xi1>, vector<8x128xf32>
      %c0_43 = arith.constant 0 : index
      %c0_44 = arith.constant 0 : index
      %86 = vector.load %arg5[%c0_43, %c0_44] : memref<8x128xf32, #tpu.memory_space<vmem>>, vector<8x128xf32>
      tpu.vector_store %arg5[%c0_43, %c0_44], %85 {strides = array<i32>} : memref<8x128xf32, #tpu.memory_space<vmem>>, vector<8x128xf32>,
    } else {
    }
    return
  }
  func.func @transform_0(%arg0: i32, %arg1: i32) -> (i32, i32) {
    %c0_i32 = arith.constant 0 : i32
    %c0_i32_0 = arith.constant 0 : i32
    return %arg0, %c0_i32 : i32, i32
  }
  func.func @transform_1(%arg0: i32, %arg1: i32) -> (i32, i32) {
    %c0_i32 = arith.constant 0 : i32
    %c0_i32_0 = arith.constant 0 : i32
    return %c0_i32, %arg1 : i32, i32
  }
  func.func @transform_2(%arg0: i32, %arg1: i32) -> (i32, i32) {
    %c0_i32 = arith.constant 0 : i32
    %c0_i32_0 = arith.constant 0 : i32
    return %arg0, %c0_i32 : i32, i32
  }
  func.func @transform_3(%arg0: i32, %arg1: i32) -> (i32, i32) {
    %c0_i32 = arith.constant 0 : i32
    %c0_i32_0 = arith.constant 0 : i32
    return %arg0, %c0_i32 : i32, i32
  }
}

</mosaic_0001>

<bundles_post_ra>
// kernel: tpu_custom_call.1
= control target key start
LH: loop header
LB: loop body
LE: loop exit
PB: predicated region body
PF: predicated region fallthrough
CT: control target
= control target key end

     0   :  { %8 = vsyncpa [#allocation6], 0  ;;  %s462_s0 = inlined_call_operand.hbm [shape: f32[8,32], index: 0, kind: input, shape index: {}]   ;;  %s463_s1 = inlined_call_operand.hbm [shape: bf16[32,8], index: 1, kind: input, shape index: {}]   ;;  %s464_s2 = inlined_call_operand.hbm [shape: s32[8,1], index: 2, kind: input, shape index: {}]   ;;  %s465_s3 = inlined_call_operand.hbm [shape: f32[8,128], index: 3, kind: output, shape index: {}]  }
   0x1   :  { %9 = vsyncpa [#allocation9], 0 }
   0x2   :  { %10 = vsyncpa [#allocation7], 0  ;;  %s361_s12 = smov [#allocation8]   ;;  %s267_s16 = scalar_lea.hbm %s463_s1, 256 }
   0x3   :  { %s26_s13 = sshll.u32 %s361_s12, 4  ;;  %p268_p0 = scmp.ne.s32.totalorder %s463_s1, %s267_s16  ;;  %s27_s13 = int_to_ptr.vmem [resolvable:$true] %s26_s13 }
   0x4   :  { %p271_p1 = scmp.lt.u32.totalorder %s267_s16, %s463_s1 }
   0x6   :  { %p273_p2 = pnand %p271_p1, %p268_p0 }
   0x8   :  { %276 = shalt.err (!%p273_p2)
}
   0x9   :  { %s277_s21 = scalar_lea.vmem %s27_s13, 256  ;;  %p282_p4 = scmp.lt.s32.totalorder %s27_s13, %s27_s13 }
   0xa   :  { %p278_p3 = scmp.ne.s32.totalorder %s27_s13, %s277_s21  ;;  %p283_p5 = scmp.lt.s32.totalorder %s277_s21, %s277_s21 }
   0xc   :  { %p284_p6 = por %p283_p5, %p282_p4 }
   0xe   :  { %p285_p7 = pnand %p284_p6, %p278_p3 }
  0x10   :  { %288 = shalt.err (!%p285_p7)
}
  0x11   :  { %s362_s22 = smov 64   ;;  %s363_s23 = smov 4  }
  0x12   :  { %32 = dma.hbm_to_vmem [thread:$0]  %s463_s1, 256, %s27_s13, [#allocation9], %s362_s22, %s362_s22, %s363_s23  }
  0x13   :  { %s364_s26 = smov [#allocation5]   ;;  %s365_s28 = smov [#allocation10]  }
  0x14   :  { %s17_s27 = sshll.u32 %s364_s26, 4  ;;  %s39_s29 = sshll.u32 %s365_s28, 4  ;;  %s18_s27 = int_to_ptr.vmem [resolvable:$true] %s17_s27  ;;  %s40_s29 = int_to_ptr.vmem [resolvable:$true] %s39_s29 }
  0x15   :  { %s289_s5 = scalar_lea.hbm %s462_s0, 128 }
  0x16   :  { %p290_p8 = scmp.ne.s32.totalorder %s462_s0, %s289_s5  ;;  %p293_p9 = scmp.lt.u32.totalorder %s289_s5, %s462_s0 }
  0x18   :  { %p295_p10 = pnand %p293_p9, %p290_p8 }
  0x1a   :  { %298 = shalt.err (!%p295_p10)
}
  0x1b   :  { %s299_s1 = scalar_lea.vmem %s18_s27, 128  ;;  %p304_p12 = scmp.lt.s32.totalorder %s18_s27, %s18_s27 }
  0x1c   :  { %p300_p11 = scmp.ne.s32.totalorder %s18_s27, %s299_s1  ;;  %p305_p13 = scmp.lt.s32.totalorder %s299_s1, %s299_s1 }
  0x1e   :  { %p306_p0 = por %p305_p13, %p304_p12 }
  0x20   :  { %p307_p1 = pnand %p306_p0, %p300_p11 }
  0x22   :  { %310 = shalt.err (!%p307_p1)
}
  0x23   :  { %20 = dma.hbm_to_vmem [thread:$0]  %s462_s0, 128, %s18_s27, [#allocation6]  }
  0x24   :  { %s311_s14 = scalar_lea.hbm %s464_s2, 128 }
  0x25   :  { %p312_p2 = scmp.ne.s32.totalorder %s464_s2, %s311_s14  ;;  %p315_p3 = scmp.lt.u32.totalorder %s311_s14, %s464_s2 }
  0x27   :  { %p317_p4 = pnand %p315_p3, %p312_p2 }
  0x29   :  { %320 = shalt.err (!%p317_p4)
}
  0x2a   :  { %s321_s19 = scalar_lea.vmem %s40_s29, 128  ;;  %p326_p6 = scmp.lt.s32.totalorder %s40_s29, %s40_s29 }
  0x2b   :  { %p322_p5 = scmp.ne.s32.totalorder %s40_s29, %s321_s19  ;;  %p327_p7 = scmp.lt.s32.totalorder %s321_s19, %s321_s19 }
  0x2d   :  { %p328_p8 = por %p327_p7, %p326_p6 }
  0x2f   :  { %p329_p9 = pnand %p328_p8, %p322_p5 }
  0x31   :  { %332 = shalt.err (!%p329_p9)
}
  0x32   :  { %42 = dma.hbm_to_vmem [thread:$0]  %s464_s2, 128, %s40_s29, [#allocation9]  }
  0x33   :  { %355 = dma.done.wait [#allocation6], 128  }
  0x34   :  { %356 = vsyncadd [#allocation6], 4294967168 }
  0x35   :  { %357 = dma.done.wait [#allocation9], 384  }
  0x36   :  { %358 = vsyncadd [#allocation9], 4294966912  ;;  %v61_v0 = vld [vmem:[#allocation5] sm:$0xff]  ;;  %vm63_vm0 = vcmask 261120   ;;  %v257_v3 = vld [vmem:[#allocation8] sm:$0xff]   ;;  %v366_v4 = vmov 0.0   ;;  %v132_v12 = vlaneseq }
  0x37   :  { %v62_v1 = vmul.f32 %v61_v0, %v61_v0  ;;  %237 = vmatprep.subr.bf16.mxu0 %v366_v4  ;;  %vm367_vm1 = vmmov 0   ;;  %v258_v5 = vld [vmem:[#allocation8 + $0x8] sm:$0xff]   ;;  %vm57_vm2 = vcmask 7168   ;;  %v368_v11 = vmov -inf   ;;  %v130_v25 = vld [vmem:[#allocation10] sm:$0xff]  ;;  %s370_s2 = smov [#allocation11]  }
  0x38   :  { %241 = vmatprep.mubr.msk.bf16.mxu0 %vm367_vm1, %v366_v4  ;;  %238 = vmatpush3.bf16.msra.mxu0 %v257_v3  ;;  %58 = vst.msk [vmem:[#allocation2] sm:$0xff] %vm57_vm2, %v368_v11  ;;  %59 = vst.msk [vmem:[#allocation3] sm:$0xff] %vm57_vm2, %v366_v4  ;;  %v433_v13 = vand.u32 127, %v132_v12  ;;  %vm148_vm4 = vcmask 64512   ;;  %v369_v20 = vmov 0   ;;  %v192_v61 = vshrl.u32 %v132_v12, 7 }
  0x39   :  { %v64_v2 = vsel %vm63_vm0, %v62_v1, 0.0  ;;  %239 = vmatprep.subr.bf16.mxu0 %v366_v4  ;;  %60 = vst.msk [vmem:[#allocation4] sm:$0xff] %vm57_vm2, %v366_v4  ;;  %255 = vset.pattern.permute.xlu1 %v369_v20  ;;  %s220_s21 = sshll.u32 %s370_s2, 4  ;;  %s221_s21 = int_to_ptr.vmem [resolvable:$true] %s220_s21 }
  0x3a   :  { %65 = vadd.xlane.f32.xlu0 %v64_v2  ;;  %vm136_vm3 = vcmp.lt.s32.totalorder %v433_v13, 8  ;;  %vm204_vm6 = vcmp.eq.s32.totalorder %v192_v61, 0  ;;  %vm205_vm7 = vcmp.eq.s32.totalorder %v433_v13, 0  ;;  %s333_s22 = scalar_lea.vmem %s221_s21, 128  ;;  %p338_p11 = scmp.lt.s32.totalorder %s221_s21, %s221_s21 }
  0x3b   :  { %256 = vset.pattern.permute.xlu0 %v369_v20  ;;  %vm206_vm8 = vmand %vm204_vm6, %vm205_vm7  ;;  %p334_p10 = scmp.ne.s32.totalorder %s221_s21, %s333_s22  ;;  %p339_p12 = scmp.lt.s32.totalorder %s333_s22, %s333_s22 }
  0x3c   :  { %240 = vmatpush3.bf16.msra.mxu0 %v258_v5 }
  0x3d   :  { %p340_p13 = por %p339_p12, %p338_p11 }
  0x3f   :  { %v156_v21 = vld [vmem:[#allocation2] sm:$0xff]  ;;  %v172_v41 = vld [vmem:[#allocation3] sm:$0xff]  ;;  %p341_p0 = pnand %p340_p13, %p334_p10 }
  0x40   :  { %v145_v40 = vld [vmem:[#allocation4] sm:$0xff] }
  0xc7   :  { %v66_v6 = vpop.xlane.xlu0 %65 }
  0xc8   :  { %v67_v7 = vmax.f32 %v66_v6, 1e-24 }
  0xca   :  { %259 = vrsqrt.f32 %v67_v7 }
  0xd4   :  { %v260_v8 = vpop.eup %259 }
  0xd5   :  { %v69_v9 = vmul.f32 %v260_v8, %v61_v0 }
  0xd7   :  { %v70_v10 = vpack.c.bf16 %v69_v9, %v69_v9 }
  0xd9   :  { %242 = vmatmul.mubr.msk.bf16.vlgmr.msra.gmra.mrb[0].mxu0 %vm63_vm0, %v70_v10 }
 0x1ac   :  { %v124_v14 = vpop.f32.mrb[0].mxu0 }
 0x1ad   :  { %v243_v15 = vpop.f32.mrb[1].mxu0  ;;  %v155_v16 = vsel %vm136_vm3, %v124_v14, -inf }
 0x1ae   :  { %v127_v17 = vpop.f32.mrb[2].mxu0  ;;  %v157_v18 = vsel %vm148_vm4, %v155_v16, -inf }
 0x1af   :  { %158 = vmax.xlane.f32.xlu0 %v157_v18  ;;  %v244_v19 = vpop.f32.mrb[3].mxu0 }
 0x23c   :  { %v159_v22 = vpop.xlane.xlu0 %158 }
 0x23d   :  { %v160_v23 = vmax.f32 %v156_v21, %v159_v22 }
 0x23f   :  { %v161_v24 = vsub.f32 %v156_v21, %v160_v23  ;;  %179 = vst.msk [vmem:[#allocation2] sm:$0xff] %vm57_vm2, %v160_v23  ;;  %166 = vperm.xlu1 %255, %v160_v23  }
 0x241   :  { %v162_v38 = vmul.f32 1.442695, %v161_v24 }
 0x243   :  { %138 = vperm.xlu1 %255, %v130_v25  }
 0x246   :  { %v183_v50 = vld [vmem:[#allocation2] sm:$0xff] }
 0x2be   :  { %v167_v26 = vpop.permute.xlu1 %166 }
 0x2bf   :  { %v169_v27 = vsub.f32 %v155_v16, %v167_v26 }
 0x2c1   :  { %v170_v28 = vmul.f32 1.442695, %v169_v27 }
 0x2c2   :  { %v139_v29 = vpop.permute.xlu1 %138 }
 0x2c3   :  { %261 = vpow2.f32 %v170_v28  ;;  %vm140_vm5 = vcmp.eq.s32.totalorder %v433_v13, %v139_v29 }
 0x2c4   :  { %v233_v30 = vsel %vm140_vm5, 1.0, %v366_v4  ;;  %263 = vpow2.f32 %v162_v38 }
 0x2c5   :  { %v143_v31 = vmul.f32 0.8857143, %v233_v30 }
 0x2c7   :  { %v144_v32 = vadd.f32 0.014285714, %v143_v31 }
 0x2c9   :  { %v146_v33 = vmul.f32 %v144_v32, %v124_v14 }
 0x2cb   :  { %v147_v34 = vsel %vm136_vm3, %v146_v33, 0.0 }
 0x2cc   :  { %v149_v35 = vsel %vm148_vm4, %v147_v34, 0.0 }
 0x2cd   :  { %v262_v36 = vpop.eup %261  ;;  %150 = vadd.xlane.f32.xlu1 %v149_v35 }
 0x2ce   :  { %v174_v37 = vsel %vm148_vm4, %v262_v36, 0.0  ;;  %v264_v39 = vpop.eup %263 }
 0x2cf   :  { %175 = vadd.xlane.f32.xlu0 %v174_v37  ;;  %v173_v44 = vmul.f32 %v264_v39, %v172_v41 }
 0x35a   :  { %v151_v42 = vpop.xlane.xlu1 %150 }
 0x35b   :  { %v152_v43 = vadd.f32 %v151_v42, %v145_v40 }
 0x35c   :  { %v176_v45 = vpop.xlane.xlu0 %175 }
 0x35d   :  { %154 = vst.msk [vmem:[#allocation4] sm:$0xff] %vm57_vm2, %v152_v43  ;;  %v177_v46 = vadd.f32 %v176_v45, %v173_v44 }
 0x35f   :  { %178 = vst.msk [vmem:[#allocation3] sm:$0xff] %vm57_vm2, %v177_v46 }
 0x364   :  { %v188_v52 = vld [vmem:[#allocation4] sm:$0xff] }
 0x366   :  { %v184_v47 = vld [vmem:[#allocation3] sm:$0xff] }
 0x367   :  { %265 = vlog2.f32 %v184_v47 }
 0x371   :  { %v266_v48 = vpop.eup %265 }
 0x372   :  { %v186_v49 = vmul.f32 0.6931472, %v266_v48 }
 0x374   :  { %v187_v51 = vadd.f32 %v186_v49, %v183_v50 }
 0x376   :  { %v189_v53 = vsub.f32 %v187_v51, %v188_v52 }
 0x378   :  { %v197_v54 = vsel %vm57_vm2, %v189_v53, 0.0 }
 0x379   :  { %v198_v55 = vrot.slane %v197_v54, 4 }
 0x37b   :  { %v199_v56 = vadd.f32 %v198_v55, %v197_v54 }
 0x37d   :  { %v200_v57 = vrot.slane %v199_v56, 2 }
 0x37f   :  { %v201_v58 = vadd.f32 %v200_v57, %v199_v56 }
 0x381   :  { %v202_v59 = vrot.slane %v201_v58, 1 }
 0x383   :  { %v203_v60 = vadd.f32 %v202_v59, %v201_v58 }
 0x385   :  { %209 = vperm.xlu0 %256, %v203_v60  }
 0x404   :  { %v210_v62 = vpop.permute.xlu0 %209 }
 0x405   :  { %v212_v63 = vsel %vm206_vm8, %v210_v62, 0.0 }
 0x406   :  { %213 = vst [vmem:[#allocation11] sm:$0xff] %v212_v63 }
 0x407   :  { %344 = shalt.err (!%p341_p0)
}
 0x408   :  { %s345_s25 = scalar_lea.hbm %s465_s3, 128 }
 0x409   :  { %p346_p1 = scmp.ne.s32.totalorder %s465_s3, %s345_s25  ;;  %p349_p2 = scmp.lt.u32.totalorder %s345_s25, %s465_s3 }
 0x40b   :  { %p351_p3 = pnand %p349_p2, %p346_p1 }
 0x40d   :  { %354 = shalt.err (!%p351_p3)
}
 0x40e   :  { %223 = dma.vmem_to_hbm [thread:$0]  %s221_s21, 128, %s465_s3, [#allocation7]  }
 0x40f   :  { %359 = dma.done.wait [#allocation7], 128  }
 0x410   :  { %360 = vsyncadd [#allocation7], 4294967168 }
 0x411   :  { %227 = vsyncpa [#allocation6], 1 }
 0x412   :  { %228 = vsyncpa [#allocation9], 1 }
 0x413   :  { %229 = vsyncpa [#allocation7], 1 }

</bundles_post_ra>
